<compile_context>
chip_gen: v7x
topology: tpu7x:2x2x1
jax: 0.10.0
libtpu: 0.0.40
codegen_flags: <defaults>
</compile_context>

<pallas_src>
import jax
import jax.numpy as jnp
from jax.experimental import pallas as pl
from jax.experimental.pallas import tpu as pltpu


def _leaky_relu(x, slope=0.2):
    return jnp.where(x > 0, x, slope * x)


def mol_discriminator_kernel(x_ref, w1_ref, b1_ref, w2_ref, b2_ref, w3_ref, b3_ref, o_ref):
    x = x_ref[...]

    # Layer 1: Linear(input_dim, hidden) + LeakyReLU(0.2); f32 accumulate/epilogue.
    h1 = jnp.dot(x, w1_ref[...], preferred_element_type=jnp.float32) + b1_ref[...]
    h1 = _leaky_relu(h1)

    # Layer 2: Linear(hidden, hidden // 2) + LeakyReLU(0.2).
    h2 = jnp.dot(h1.astype(w2_ref.dtype), w2_ref[...],
                 preferred_element_type=jnp.float32) + b2_ref[...]
    h2 = _leaky_relu(h2)

    # Layer 3: Linear(hidden // 2, 1) + Sigmoid, computed lane-dense.
    # w3_row (1, half) contracted with h2 (block_b, half) over the feature (lane)
    # dim -> (1, block_b).  Avoids an N=1 padded matmul and masked 1-lane stores.
    h3 = jax.lax.dot_general(
        w3_ref[...], h2.astype(w3_ref.dtype),
        dimension_numbers=(((1,), (1,)), ((), ())),
        preferred_element_type=jnp.float32,
    ) + b3_ref[...]

    o_ref[...] = jax.nn.sigmoid(h3).reshape(o_ref.shape).astype(o_ref.dtype)


def mol_discriminator(x, params, *, block_b=None, compute_dtype=jnp.float32):
    """x: [B, input_dim]. params: dict of w1,b1,w2,b2,w3,b3 (see init_params)."""
    B, input_dim = x.shape
    hidden = params["w1"].shape[1]
    half = params["w2"].shape[1]

    # Batch tile: full batch when small (block == full dim is always legal);
    # otherwise a lane-dense, sublane-aligned 512-row tile.
    if block_b is None:
        block_b = B if B <= 512 else 512
    block_b = max(1, min(block_b, B))
    if block_b != B:
        block_b = max(8, (block_b // 8) * 8)  # keep sublane alignment when tiling
    num_blocks = pl.cdiv(B, block_b)

    itemsize = jnp.dtype(compute_dtype).itemsize

    # Cast matmul operands to compute_dtype (bf16 halves HBM traffic on the dominant
    # x stream); biases stay f32, accumulation/epilogues are f32 in-kernel.
    x_c = x.astype(compute_dtype)
    w1 = params["w1"].astype(compute_dtype)
    w2 = params["w2"].astype(compute_dtype)
    w3 = params["w3"].reshape(1, half).astype(compute_dtype)  # row layout for layer 3
    b1 = params["b1"].reshape(1, hidden).astype(jnp.float32)
    b2 = params["b2"].reshape(1, half).astype(jnp.float32)
    b3 = params["b3"].reshape(1, 1).astype(jnp.float32)

    # Advisory cost estimate for XLA scheduling.
    weight_bytes = (input_dim * hidden + hidden * half + half) * itemsize \
                   + (hidden + half + 1) * 4
    cost = pl.CostEstimate(
        flops=2 * B * (input_dim * hidden + hidden * half + half),
        transcendentals=B,  # one sigmoid exp per row
        bytes_accessed=B * input_dim * itemsize + weight_bytes + num_blocks * block_b * 4,
    )

    # Explicit VMEM budget: double-buffered x/out tiles + resident weights + h1/h2 temps.
    vmem_est = (2 * block_b * input_dim * itemsize
                + 2 * block_b * 4
                + weight_bytes
                + block_b * (hidden + half) * 4)
    vmem_limit = int(min(max(4 * vmem_est, 16 * 2**20), 64 * 2**20))

    out_packed = pl.pallas_call(
        mol_discriminator_kernel,
        out_shape=jax.ShapeDtypeStruct((num_blocks, 1, block_b), jnp.float32),
        grid_spec=pltpu.PrefetchScalarGridSpec(
            num_scalar_prefetch=0,
            grid=(num_blocks,),
            in_specs=[
                pl.BlockSpec((block_b, input_dim), lambda i: (i, 0)),  # x tile (streamed)
                pl.BlockSpec((input_dim, hidden), lambda i: (0, 0)),   # w1 (grid-invariant)
                pl.BlockSpec((1, hidden), lambda i: (0, 0)),           # b1
                pl.BlockSpec((hidden, half), lambda i: (0, 0)),        # w2
                pl.BlockSpec((1, half), lambda i: (0, 0)),             # b2
                pl.BlockSpec((1, half), lambda i: (0, 0)),             # w3 row
                pl.BlockSpec((1, 1), lambda i: (0, 0)),                # b3
            ],
            # Lane-dense packed output: one (1, block_b) row per batch tile.
            out_specs=pl.BlockSpec((1, 1, block_b), lambda i: (i, 0, 0)),
        ),
        compiler_params=pltpu.CompilerParams(
            dimension_semantics=("parallel",),
            vmem_limit_bytes=vmem_limit,
        ),
        cost_estimate=cost,
    )(x_c, w1, b1, w2, b2, w3, b3)

    # Unpack (num_blocks, 1, block_b) -> (B, 1); padded tail lanes (if any) are dropped.
    return out_packed.reshape(-1)[:B].reshape(B, 1)


def init_params(key, input_dim, hidden_dim):
    """Deterministic parameter init (Kaiming-uniform-like, as nn.Linear default)."""
    k1, k2, k3, k4, k5, k6 = jax.random.split(key, 6)

    def lin_init(kw, kb, fan_in, fan_out):
        bound = 1.0 / jnp.sqrt(fan_in)
        w = jax.random.uniform(kw, (fan_in, fan_out), jnp.float32, -bound, bound)
        b = jax.random.uniform(kb, (1, fan_out), jnp.float32, -bound, bound)
        return w, b

    half = hidden_dim // 2
    w1, b1 = lin_init(k1, k2, input_dim, hidden_dim)
    w2, b2 = lin_init(k3, k4, hidden_dim, half)
    w3, b3 = lin_init(k5, k6, half, 1)
    return {"w1": w1, "b1": b1, "w2": w2, "b2": b2, "w3": w3, "b3": b3}


def reference_forward(x, p):
    """Pure-JAX reference mirroring the PyTorch module exactly."""
    h = x @ p["w1"] + p["b1"]
    h = jnp.where(h > 0, h, 0.2 * h)
    h = h @ p["w2"] + p["b2"]
    h = jnp.where(h > 0, h, 0.2 * h)
    h = h @ p["w3"] + p["b3"]
    return jax.nn.sigmoid(h)


if __name__ == "__main__":
    key = jax.random.PRNGKey(0)
    kx, kp = jax.random.split(key)

    B, input_dim, hidden_dim = 8, 16, 32
    x = jax.random.normal(kx, (B, input_dim), jnp.float32)
    params = init_params(kp, input_dim, hidden_dim)

    out = mol_discriminator(x, params)  # f32 path keeps strict numerics
    out = jax.block_until_ready(out)

    ref = reference_forward(x, params)
    assert out.shape == (B, 1), out.shape
    assert jnp.allclose(out, ref, atol=1e-5, rtol=1e-5), (out, ref)

    print("KERNEL_OK")
</pallas_src>

<mosaic_0001>
module attributes {stable_mosaic.version = 11 : i64} {
  func.func @mol_discriminator_kernel(%arg0: i32, %arg1: memref<8x16xf32, #tpu.memory_space<vmem>>, %arg2: memref<16x32xf32, #tpu.memory_space<vmem>>, %arg3: memref<1x32xf32, #tpu.memory_space<vmem>>, %arg4: memref<32x16xf32, #tpu.memory_space<vmem>>, %arg5: memref<1x16xf32, #tpu.memory_space<vmem>>, %arg6: memref<1x16xf32, #tpu.memory_space<vmem>>, %arg7: memref<1x1xf32, #tpu.memory_space<vmem>>, %arg8: memref<1x1x8xf32, #tpu.memory_space<vmem>>) attributes {dimension_semantics = [#tpu.dimension_semantics<parallel>], iteration_bounds = array<i64: 1>, scalar_prefetch = 0 : i64, scratch_operands = 0 : i64, tpu.core_type = #tpu.core_type<tc>, window_params = [{transform_indices = @transform_0, window_bounds = array<i64: 8, 16>}, {pipeline_mode = #tpu.pipeline_mode<synchronous>, transform_indices = @transform_1, window_bounds = array<i64: 16, 32>}, {pipeline_mode = #tpu.pipeline_mode<synchronous>, transform_indices = @transform_2, window_bounds = array<i64: 1, 32>}, {pipeline_mode = #tpu.pipeline_mode<synchronous>, transform_indices = @transform_3, window_bounds = array<i64: 32, 16>}, {pipeline_mode = #tpu.pipeline_mode<synchronous>, transform_indices = @transform_4, window_bounds = array<i64: 1, 16>}, {pipeline_mode = #tpu.pipeline_mode<synchronous>, transform_indices = @transform_5, window_bounds = array<i64: 1, 16>}, {pipeline_mode = #tpu.pipeline_mode<synchronous>, transform_indices = @transform_6, window_bounds = array<i64: 1, 1>}, {transform_indices = @transform_7, window_bounds = array<i64: 1, 1, 8>}]} {
    %c0 = arith.constant 0 : index
    %c0_0 = arith.constant 0 : index
    %0 = vector.load %arg1[%c0, %c0_0] : memref<8x16xf32, #tpu.memory_space<vmem>>, vector<8x16xf32>
    %c0_1 = arith.constant 0 : index
    %c0_2 = arith.constant 0 : index
    %1 = vector.load %arg2[%c0_1, %c0_2] : memref<16x32xf32, #tpu.memory_space<vmem>>, vector<16x32xf32>
    %cst = arith.constant dense<0.000000e+00> : vector<8x32xf32>
    %2 = tpu.matmul %0, %1, %cst {dimension_numbers = #tpu.dot_dimension_numbers<[1], [0], [0], [1], [0, 0, 1, 1], [], []>} : vector<8x16xf32>, vector<16x32xf32>, vector<8x32xf32> -> vector<8x32xf32>
    %c0_3 = arith.constant 0 : index
    %c0_4 = arith.constant 0 : index
    %3 = vector.load %arg3[%c0_3, %c0_4] : memref<1x32xf32, #tpu.memory_space<vmem>>, vector<1x32xf32>
    %4 = vector.broadcast %3 : vector<1x32xf32> to vector<8x32xf32>
    %5 = arith.addf %2, %4 : vector<8x32xf32>
    %cst_5 = arith.constant 0.000000e+00 : f32
    %6 = vector.broadcast %cst_5 : f32 to vector<8x32xf32>
    %7 = arith.cmpf ogt, %5, %6 : vector<8x32xf32>
    %cst_6 = arith.constant 2.000000e-01 : f32
    %8 = vector.broadcast %cst_6 : f32 to vector<8x32xf32>
    %9 = arith.mulf %8, %5 : vector<8x32xf32>
    %10 = arith.select %7, %5, %9 : vector<8x32xi1>, vector<8x32xf32>
    %c0_7 = arith.constant 0 : index
    %c0_8 = arith.constant 0 : index
    %11 = vector.load %arg4[%c0_7, %c0_8] : memref<32x16xf32, #tpu.memory_space<vmem>>, vector<32x16xf32>
    %cst_9 = arith.constant dense<0.000000e+00> : vector<8x16xf32>
    %12 = tpu.matmul %10, %11, %cst_9 {dimension_numbers = #tpu.dot_dimension_numbers<[1], [0], [0], [1], [0, 0, 1, 1], [], []>} : vector<8x32xf32>, vector<32x16xf32>, vector<8x16xf32> -> vector<8x16xf32>
    %c0_10 = arith.constant 0 : index
    %c0_11 = arith.constant 0 : index
    %13 = vector.load %arg5[%c0_10, %c0_11] : memref<1x16xf32, #tpu.memory_space<vmem>>, vector<1x16xf32>
    %14 = vector.broadcast %13 : vector<1x16xf32> to vector<8x16xf32>
    %15 = arith.addf %12, %14 : vector<8x16xf32>
    %cst_12 = arith.constant 0.000000e+00 : f32
    %16 = vector.broadcast %cst_12 : f32 to vector<8x16xf32>
    %17 = arith.cmpf ogt, %15, %16 : vector<8x16xf32>
    %cst_13 = arith.constant 2.000000e-01 : f32
    %18 = vector.broadcast %cst_13 : f32 to vector<8x16xf32>
    %19 = arith.mulf %18, %15 : vector<8x16xf32>
    %20 = arith.select %17, %15, %19 : vector<8x16xi1>, vector<8x16xf32>
    %c0_14 = arith.constant 0 : index
    %c0_15 = arith.constant 0 : index
    %21 = vector.load %arg6[%c0_14, %c0_15] : memref<1x16xf32, #tpu.memory_space<vmem>>, vector<1x16xf32>
    %cst_16 = arith.constant dense<0.000000e+00> : vector<1x8xf32>
    %22 = tpu.matmul %21, %20, %cst_16 {dimension_numbers = #tpu.dot_dimension_numbers<[1], [1], [0], [0], [0, 0, 1, 0], [], []>} : vector<1x16xf32>, vector<8x16xf32>, vector<1x8xf32> -> vector<1x8xf32>
    %c0_17 = arith.constant 0 : index
    %c0_18 = arith.constant 0 : index
    %23 = vector.load %arg7[%c0_17, %c0_18] : memref<1x1xf32, #tpu.memory_space<vmem>>, vector<1x1xf32>
    %24 = vector.broadcast %23 : vector<1x1xf32> to vector<1x8xf32>
    %25 = arith.addf %22, %24 : vector<1x8xf32>
    %26 = arith.negf %25 : vector<1x8xf32>
    %27 = math.exp %26 : vector<1x8xf32>
    %cst_19 = arith.constant 1.000000e+00 : f32
    %28 = vector.broadcast %cst_19 : f32 to vector<1x8xf32>
    %29 = arith.addf %28, %27 : vector<1x8xf32>
    %30 = arith.divf %28, %29 : vector<1x8xf32>
    %31 = vector.shape_cast %30 : vector<1x8xf32> to vector<1x1x8xf32>
    %c0_20 = arith.constant 0 : index
    %c0_21 = arith.constant 0 : index
    %c0_22 = arith.constant 0 : index
    %32 = vector.load %arg8[%c0_20, %c0_21, %c0_22] : memref<1x1x8xf32, #tpu.memory_space<vmem>>, vector<1x1x8xf32>
    tpu.vector_store %arg8[%c0_20, %c0_21, %c0_22], %31 {strides = array<i32>} : memref<1x1x8xf32, #tpu.memory_space<vmem>>, vector<1x1x8xf32>,
    return
  }
  func.func @transform_0(%arg0: i32) -> (i32, i32) {
    %c0_i32 = arith.constant 0 : i32
    %c0_i32_0 = arith.constant 0 : i32
    return %arg0, %c0_i32 : i32, i32
  }
  func.func @transform_1(%arg0: i32) -> (i32, i32) {
    %c0_i32 = arith.constant 0 : i32
    %c0_i32_0 = arith.constant 0 : i32
    %c0_i32_1 = arith.constant 0 : i32
    return %c0_i32, %c0_i32_0 : i32, i32
  }
  func.func @transform_2(%arg0: i32) -> (i32, i32) {
    %c0_i32 = arith.constant 0 : i32
    %c0_i32_0 = arith.constant 0 : i32
    %c0_i32_1 = arith.constant 0 : i32
    return %c0_i32, %c0_i32_0 : i32, i32
  }
  func.func @transform_3(%arg0: i32) -> (i32, i32) {
    %c0_i32 = arith.constant 0 : i32
    %c0_i32_0 = arith.constant 0 : i32
    %c0_i32_1 = arith.constant 0 : i32
    return %c0_i32, %c0_i32_0 : i32, i32
  }
  func.func @transform_4(%arg0: i32) -> (i32, i32) {
    %c0_i32 = arith.constant 0 : i32
    %c0_i32_0 = arith.constant 0 : i32
    %c0_i32_1 = arith.constant 0 : i32
    return %c0_i32, %c0_i32_0 : i32, i32
  }
  func.func @transform_5(%arg0: i32) -> (i32, i32) {
    %c0_i32 = arith.constant 0 : i32
    %c0_i32_0 = arith.constant 0 : i32
    %c0_i32_1 = arith.constant 0 : i32
    return %c0_i32, %c0_i32_0 : i32, i32
  }
  func.func @transform_6(%arg0: i32) -> (i32, i32) {
    %c0_i32 = arith.constant 0 : i32
    %c0_i32_0 = arith.constant 0 : i32
    %c0_i32_1 = arith.constant 0 : i32
    return %c0_i32, %c0_i32_0 : i32, i32
  }
  func.func @transform_7(%arg0: i32) -> (i32, i32, i32) {
    %c0_i32 = arith.constant 0 : i32
    %c0_i32_0 = arith.constant 0 : i32
    %c0_i32_1 = arith.constant 0 : i32
    return %arg0, %c0_i32, %c0_i32_0 : i32, i32, i32
  }
}

</mosaic_0001>

<bundles_post_ra>
// kernel: tpu_custom_call.1
= control target key start
LH: loop header
LB: loop body
LE: loop exit
PB: predicated region body
PF: predicated region fallthrough
CT: control target
= control target key end

     0   :  { %s492_s0 = inlined_call_operand.vmem [shape: f32[8,16], index: 0, kind: input, shape index: {}]   ;;  %s493_s1 = inlined_call_operand.vmem [shape: f32[16,32], index: 1, kind: input, shape index: {}]   ;;  %s494_s2 = inlined_call_operand.vmem [shape: f32[1,32], index: 2, kind: input, shape index: {}]   ;;  %s495_s3 = inlined_call_operand.vmem [shape: f32[32,16], index: 3, kind: input, shape index: {}]   ;;  %s496_s4 = inlined_call_operand.vmem [shape: f32[1,16], index: 4, kind: input, shape index: {}]   ;;  %s497_s5 = inlined_call_operand.vmem [shape: f32[1,16], index: 5, kind: input, shape index: {}]   ;;  %s498_s6 = inlined_call_operand.<no memory space> [shape: f32[1,1], index: 6, kind: input, shape index: {}]   ;;  %s499_s7 = inlined_call_operand.hbm [shape: f32[1,1,8], index: 7, kind: output, shape index: {}]  }
   0x1   :  { %v12_v0 = vstv %s498_s6 }
   0x2   :  { %13 = vst [vmem:[#allocation2] sm:$0x1] %v12_v0 }
   0x3   :  { %v30_v1 = vld [vmem:[%s493_s1] sm:$0xff]  ;;  %v31_v2 = vld [vmem:[%s493_s1 + $0x8] sm:$0xff]  ;;  %v396_v3 = vmov 0.0|0.0   ;;  %vm397_vm0 = vmmov 0   ;;  %v398_v5 = vmov 0.0  }
   0x4   :  { %353 = vmatprep.subr.bf16.mxu0 %v396_v3  ;;  %v354_v4 = vpack.c.bf16 %v31_v2, %v30_v1  ;;  %334 = vmatprep.mubr.msk.f32.mxu0 %vm397_vm0, %v398_v5  ;;  %v116_v6 = vld [vmem:[%s495_s3] sm:$0xff]  ;;  %v117_v7 = vld [vmem:[%s495_s3 + $0x8] sm:$0xff] }
   0x5   :  { %356 = vmatprep.subr.bf16.mxu1 %v396_v3  ;;  %v357_v8 = vpack.c.bf16 %v117_v7, %v116_v6  ;;  %345 = vmatprep.mubr.msk.f32.mxu1 %vm397_vm0, %v398_v5 }
   0x6   :  { %14 = vsyncpa [#allocation4], 0  ;;  %355 = vmatpush3.bf16.msra.mxu0 %v354_v4  ;;  %v29_v9 = vld [vmem:[%s492_s0] sm:$0xff]  ;;  %vm39_vm1 = vcmask 130048   ;;  %v118_v10 = vld [vmem:[%s495_s3 + $0x10] sm:$0xff]  ;;  %vm127_vm3 = vcmask 261120   ;;  %v211_v28 = vlaneseq }
   0x7   :  { %358 = vmatpush3.bf16.msra.mxu1 %v357_v8  ;;  %348 = vmatprep.subr.mxu0 %v398_v5  ;;  %v119_v11 = vld [vmem:[%s495_s3 + $0x18] sm:$0xff]  ;;  %v313_v13 = vld [vmem:[%s494_s2] ss:$0 sm:$0xff]  ;;  %v399_v20 = vmov 0   ;;  %vm297_vm5 = vcmask 57344  }
   0x8   :  { %359 = vmatprep.subr.bf16.mxu1 %v396_v3  ;;  %v360_v12 = vpack.c.bf16 %v119_v11, %v118_v10  ;;  %367 = vset.pattern.permute.xlu0 %v399_v20  ;;  %v315_v21 = vld [vmem:[%s496_s4] ss:$0 sm:$0xff]  ;;  %v212_v29 = vshrl.u32 %v211_v28, 7  ;;  %s400_s4 = smov [#allocation3]  }
   0x9   :  { %335 = vmatmul.mubr.msk.f32.vlgmr.msra.gmra.mrb[0].mxu0 %vm39_vm1, %v29_v9  ;;  %v205_v19 = vld [vmem:[#allocation2] sm:$0x1]  ;;  %s305_s18 = sshll.u32 %s400_s4, 4  ;;  %s306_s18 = int_to_ptr.vmem [resolvable:$true] %s305_s18 }
   0xa   :  { %350 = vmatprep.mubr.msk.f32.mxu0 %vm397_vm0, %v398_v5  ;;  %208 = vperm.xlu0 %367, %v205_v19   ;;  %v204_v27 = vld [vmem:[%s497_s5] sm:$0x1]  ;;  %v213_v30 = vsub.s32 0, %v212_v29  ;;  %s372_s5 = scalar_lea.vmem %s306_s18, 16  ;;  %s376_s19 = scalar_lea.vmem %s306_s18, 32 }
   0xb   :  { %361 = vmatpush3.bf16.msra.mxu1 %v360_v12  ;;  %p373_p0 = scmp.ne.s32.totalorder %s306_s18, %s372_s5  ;;  %p377_p1 = scmp.lt.s32.totalorder %s306_s18, %s306_s18 }
   0xc   :  { %p378_p2 = scmp.lt.s32.totalorder %s376_s19, %s372_s5 }
   0xe   :  { %p379_p3 = por %p378_p2, %p377_p1 }
  0x10   :  { %p380_p4 = pnand %p379_p3, %p373_p0 }
  0x89   :  { %v209_v31 = vpop.permute.xlu0 %208 }
  0x8a   :  { %v214_v32 = vrot.slane %v209_v31, %v213_v30 }
  0xdc   :  { %v109_v14 = vpop.f32.mrb[0].mxu0 }
  0xdd   :  { %v110_v15 = vadd.f32 %v313_v13, %v109_v14  ;;  %v336_v16 = vpop.f32.mrb[1].mxu0 }
  0xdf   :  { %vm113_vm2 = vcmp.gt.f32.partialorder %v110_v15, 0.0  ;;  %v114_v17 = vmul.f32 0.2, %v110_v15 }
  0xe1   :  { %v115_v18 = vsel %vm113_vm2, %v110_v15, %v114_v17 }
  0xe2   :  { %346 = vmatmul.mubr.msk.f32.vlgmr.msra.gmra.mrb[0].mxu1 %vm127_vm3, %v115_v18 }
 0x1b5   :  { %v197_v22 = vpop.f32.mrb[0].mxu1 }
 0x1b6   :  { %v198_v23 = vadd.f32 %v315_v21, %v197_v22  ;;  %v347_v24 = vpop.f32.mrb[1].mxu1 }
 0x1b8   :  { %vm201_vm4 = vcmp.gt.f32.partialorder %v198_v23, 0.0  ;;  %v202_v25 = vmul.f32 0.2, %v198_v23 }
 0x1ba   :  { %v203_v26 = vsel %vm201_vm4, %v198_v23, %v202_v25 }
 0x1bb   :  { %349 = vmatpush3.xpose.msk.msra.mxu0 %vm39_vm1, %v203_v26 }
 0x1be   :  { %351 = vmatmul.mubr.msk.f32.vlgmr.msra.gmra.mrb[2].mxu0 %vm39_vm1, %v204_v27 }
 0x291   :  { %v287_v33 = vpop.f32.mrb[2].mxu0 }
 0x292   :  { %v288_v34 = vadd.f32 %v287_v33, %v214_v32  ;;  %v352_v35 = vpop.f32.mrb[3].mxu0 }
 0x294   :  { %v319_v36 = vmul.f32 -1.442695, %v288_v34 }
 0x296   :  { %368 = vpow2.f32 %v319_v36 }
 0x2a0   :  { %v369_v37 = vpop.eup %368 }
 0x2a1   :  { %v294_v38 = vadd.f32 1.0, %v369_v37 }
 0x2a3   :  { %370 = vrcp.f32 %v294_v38 }
 0x2ad   :  { %v371_v39 = vpop.eup %370 }
 0x2ae   :  { %298 = vst.msk [vmem:[#allocation3] sm:$0x1] %vm297_vm5, %v371_v39 }
 0x2af   :  { %383 = shalt.err (!%p380_p4)
}
 0x2b0   :  { %s384_s22 = scalar_lea.hbm %s499_s7, 16 }
 0x2b1   :  { %p385_p5 = scmp.ne.s32.totalorder %s499_s7, %s384_s22  ;;  %p388_p6 = scmp.lt.u32.totalorder %s384_s22, %s499_s7 }
 0x2b3   :  { %p390_p7 = pnand %p388_p6, %p385_p5 }
 0x2b5   :  { %393 = shalt.err (!%p390_p7)
}
 0x2b6   :  { %308 = dma.vmem_to_hbm [thread:$0]  %s306_s18, 16, %s499_s7, [#allocation4]  }
 0x2b7   :  { %394 = dma.done.wait [#allocation4], 16  }
 0x2b8   :  { %395 = vsyncadd [#allocation4], 4294967280 }
 0x2b9   :  { %312 = vsyncpa [#allocation4], 1 }

</bundles_post_ra>
